<compile_context>
chip_gen: v7x
topology: tpu7x:2x2x1
jax: 0.10.0
libtpu: 0.0.40
codegen_flags: <defaults>
</compile_context>

<pallas_src>
import jax
import jax.numpy as jnp
from jax.experimental import pallas as pl
from jax.experimental.pallas import tpu as pltpu


def _round_up(v, m):
    return (v + m - 1) // m * m


def _vae_kernel(x_ref, eps_ref,
                w1_ref, b1_ref, w2_ref, b2_ref,
                whd_ref, bhd_ref,
                w3_ref, b3_ref, w4_ref, b4_ref,
                w5_ref, b5_ref,
                out_ref):
    din = x_ref.shape[1]       # input_dim (static)
    lat = eps_ref.shape[1]     # latent_dim (static)
    f32 = jnp.float32

    x = x_ref[...]

    # ---- encoder: Linear(input_dim,128)+ReLU, Linear(128,64)+ReLU ----
    h = jnp.dot(x, w1_ref[...], preferred_element_type=f32) + b1_ref[...]
    h = jnp.maximum(h, 0.0)
    h = jnp.dot(h, w2_ref[...], preferred_element_type=f32) + b2_ref[...]
    h = jnp.maximum(h, 0.0)

    # ---- mu / log_var heads, pre-placed at slab column offsets:
    #      columns [din:din+lat] = mu, [din+lat:din+2*lat] = log_var, rest 0.
    heads = jnp.dot(h, whd_ref[...], preferred_element_type=f32) + bhd_ref[...]
    mu = heads[:, din:din + lat]
    log_var = heads[:, din + lat:din + 2 * lat]

    # ---- reparameterize at latent width (no padding): z = mu + eps*exp(0.5*lv)
    z = mu + eps_ref[...] * jnp.exp(0.5 * log_var)

    # ---- decoder: Linear(latent,64)+ReLU, Linear(64,128)+ReLU, Linear(128,·)
    d = jnp.dot(z, w3_ref[...], preferred_element_type=f32) + b3_ref[...]
    d = jnp.maximum(d, 0.0)
    d = jnp.dot(d, w4_ref[...], preferred_element_type=f32) + b4_ref[...]
    d = jnp.maximum(d, 0.0)
    # w5_slab has the real decoder weights in columns [:din] and zeros elsewhere,
    # so recon lands directly in slab columns [:din] with no lane shuffles.
    recon_slab = jnp.dot(d, w5_ref[...], preferred_element_type=f32) + b5_ref[...]

    # ---- fused, lane-dense output slab: [recon | mu | log_var | 0]
    #      (heads is zero in [:din] and in the padding lanes; recon_slab is zero
    #       outside [:din], so the sum is exact.)
    out_ref[...] = recon_slab + heads


def prepare_params(params, input_dim, latent_dim):
    """One-time parameter fusion/padding (hoisted out of the hot path).

    Weights are stored [in, out]; biases [1, out].  The mu/log_var head weights
    are placed at their fused-output column offsets; the last decoder weight is
    zero-padded on the output side to the slab width.
    """
    f32 = jnp.float32
    out_w = _round_up(input_dim + 2 * latent_dim, 128)

    whd = jnp.zeros((64, out_w), f32)
    whd = whd.at[:, input_dim:input_dim + latent_dim].set(params["wmu"])
    whd = whd.at[:, input_dim + latent_dim:input_dim + 2 * latent_dim].set(params["wlv"])
    bhd = jnp.zeros((1, out_w), f32)
    bhd = bhd.at[:, input_dim:input_dim + latent_dim].set(params["bmu"])
    bhd = bhd.at[:, input_dim + latent_dim:input_dim + 2 * latent_dim].set(params["blv"])

    w5 = jnp.zeros((128, out_w), f32).at[:, :input_dim].set(params["w5"])
    b5 = jnp.zeros((1, out_w), f32).at[:, :input_dim].set(params["b5"])

    return {
        "w1": params["w1"], "b1": params["b1"],
        "w2": params["w2"], "b2": params["b2"],
        "whd": whd, "bhd": bhd,
        "w3": params["w3"], "b3": params["b3"],
        "w4": params["w4"], "b4": params["b4"],
        "w5": w5, "b5": b5,
    }


@jax.jit
def vae_forward(x, eps, prepared):
    """VAE forward: one Pallas kernel, batch-gridded with VMEM-resident weights.

    x:   [B, input_dim] f32
    eps: [B, latent_dim] f32  (the randn_like noise, passed explicitly so the
                               result is deterministic / checkable)
    prepared: output of prepare_params().
    Returns (reconstruction [B,input_dim], mu [B,latent], log_var [B,latent]).
    """
    B, input_dim = x.shape
    latent_dim = eps.shape[1]
    out_w = prepared["w5"].shape[1]           # fused slab width (multiple of 128)
    f32 = jnp.float32

    # ---- batch tile: large tiles amortize the ~0.35us per-grid-step overhead,
    #      but keep the double-buffered streamed + intermediate footprint small
    #      enough for v7x's 64 MiB VMEM.
    row_bytes = 4 * (2 * (input_dim + latent_dim + out_w)   # double-buffered streams
                     + 4 * 128 + 3 * out_w)                 # in-kernel f32 temporaries
    tb_cap = (20 * 1024 * 1024) // row_bytes
    tb_cap = max(256, min(2048, (tb_cap // 8) * 8))
    tb_small = _round_up(B, 8)
    tb = tb_small if tb_small <= tb_cap else tb_cap
    bp = _round_up(B, tb)

    # ---- pad streamed inputs only when actually needed ----
    if bp == B:
        x_p, eps_p = x, eps
    else:
        x_p = jnp.pad(x, ((0, bp - B), (0, 0)))
        eps_p = jnp.pad(eps, ((0, bp - B), (0, 0)))

    weight_keys = ("w1", "b1", "w2", "b2", "whd", "bhd",
                   "w3", "b3", "w4", "b4", "w5", "b5")
    weights = tuple(prepared[k] for k in weight_keys)

    def stream_spec(width):        # streamed along the batch grid axis
        return pl.BlockSpec((tb, width), lambda i: (i, 0))

    def resident_spec(shape):      # constant block index -> stays in VMEM
        return pl.BlockSpec(shape, lambda i: (0, 0))

    in_specs = ([stream_spec(input_dim), stream_spec(latent_dim)]
                + [resident_spec(w.shape) for w in weights])
    out_specs = stream_spec(out_w)
    out_shape = jax.ShapeDtypeStruct((bp, out_w), f32)

    out = pl.pallas_call(
        _vae_kernel,
        out_shape=out_shape,
        grid=(bp // tb,),
        in_specs=in_specs,
        out_specs=out_specs,
        compiler_params=pltpu.CompilerParams(
            dimension_semantics=("parallel",),
            vmem_limit_bytes=32 * 1024 * 1024),
    )(x_p, eps_p, *weights)

    recon = out[:B, :input_dim]
    mu = out[:B, input_dim:input_dim + latent_dim]
    log_var = out[:B, input_dim + latent_dim:input_dim + 2 * latent_dim]
    return recon, mu, log_var


def init_params(key, input_dim, latent_dim):
    """Deterministic init mimicking PyTorch nn.Linear (U(-1/sqrt(fan_in), +)).

    Weights stored as [in, out] (transposed vs torch's [out, in]); biases [1, out].
    """
    dims = {
        "1": (input_dim, 128),
        "2": (128, 64),
        "mu": (64, latent_dim),
        "lv": (64, latent_dim),
        "3": (latent_dim, 64),
        "4": (64, 128),
        "5": (128, input_dim),
    }
    params = {}
    for name, (fan_in, fan_out) in dims.items():
        key, kw, kb = jax.random.split(key, 3)
        bound = 1.0 / (fan_in ** 0.5)
        params[f"w{name}"] = jax.random.uniform(
            kw, (fan_in, fan_out), jnp.float32, -bound, bound)
        params[f"b{name}"] = jax.random.uniform(
            kb, (1, fan_out), jnp.float32, -bound, bound)
    return params


def vae_reference(x, eps, params):
    """Pure-JAX reference for correctness checking."""
    relu = lambda v: jnp.maximum(v, 0.0)
    h = relu(x @ params["w1"] + params["b1"])
    h = relu(h @ params["w2"] + params["b2"])
    mu = h @ params["wmu"] + params["bmu"]
    log_var = h @ params["wlv"] + params["blv"]
    z = mu + eps * jnp.exp(0.5 * log_var)
    d = relu(z @ params["w3"] + params["b3"])
    d = relu(d @ params["w4"] + params["b4"])
    recon = d @ params["w5"] + params["b5"]
    return recon, mu, log_var


if __name__ == "__main__":
    INPUT_DIM = 32
    LATENT_DIM = 8
    BATCH = 8

    key = jax.random.PRNGKey(0)
    key, kx, keps, kp = jax.random.split(key, 4)

    x = jax.random.normal(kx, (BATCH, INPUT_DIM), jnp.float32)
    # torch.randn_like(std) noise is drawn here (deterministically) and fed in.
    eps = jax.random.normal(keps, (BATCH, LATENT_DIM), jnp.float32)
    params = init_params(kp, INPUT_DIM, LATENT_DIM)
    prepared = prepare_params(params, INPUT_DIM, LATENT_DIM)   # one-time prep

    recon, mu, log_var = vae_forward(x, eps, prepared)
    jax.block_until_ready((recon, mu, log_var))

    # sanity check against pure-JAX reference
    r_ref, mu_r, lv_r = vae_reference(x, eps, params)
    assert recon.shape == (BATCH, INPUT_DIM)
    assert mu.shape == (BATCH, LATENT_DIM)
    assert log_var.shape == (BATCH, LATENT_DIM)
    assert jnp.allclose(recon, r_ref, atol=1e-4, rtol=1e-4)
    assert jnp.allclose(mu, mu_r, atol=1e-5, rtol=1e-5)
    assert jnp.allclose(log_var, lv_r, atol=1e-5, rtol=1e-5)

    print("KERNEL_OK")
</pallas_src>

<mosaic_0001>
module attributes {stable_mosaic.version = 11 : i64} {
  func.func @_vae_kernel(%arg0: i32, %arg1: memref<8x32xf32, #tpu.memory_space<vmem>>, %arg2: memref<8x8xf32, #tpu.memory_space<vmem>>, %arg3: memref<32x128xf32, #tpu.memory_space<vmem>>, %arg4: memref<1x128xf32, #tpu.memory_space<vmem>>, %arg5: memref<128x64xf32, #tpu.memory_space<vmem>>, %arg6: memref<1x64xf32, #tpu.memory_space<vmem>>, %arg7: memref<64x128xf32, #tpu.memory_space<vmem>>, %arg8: memref<1x128xf32, #tpu.memory_space<vmem>>, %arg9: memref<8x64xf32, #tpu.memory_space<vmem>>, %arg10: memref<1x64xf32, #tpu.memory_space<vmem>>, %arg11: memref<64x128xf32, #tpu.memory_space<vmem>>, %arg12: memref<1x128xf32, #tpu.memory_space<vmem>>, %arg13: memref<128x128xf32, #tpu.memory_space<vmem>>, %arg14: memref<1x128xf32, #tpu.memory_space<vmem>>, %arg15: memref<8x128xf32, #tpu.memory_space<vmem>>) attributes {dimension_semantics = [#tpu.dimension_semantics<parallel>], iteration_bounds = array<i64: 1>, scalar_prefetch = 0 : i64, scratch_operands = 0 : i64, tpu.core_type = #tpu.core_type<tc>, window_params = [{transform_indices = @transform_0, window_bounds = array<i64: 8, 32>}, {transform_indices = @transform_1, window_bounds = array<i64: 8, 8>}, {pipeline_mode = #tpu.pipeline_mode<synchronous>, transform_indices = @transform_2, window_bounds = array<i64: 32, 128>}, {pipeline_mode = #tpu.pipeline_mode<synchronous>, transform_indices = @transform_3, window_bounds = array<i64: 1, 128>}, {pipeline_mode = #tpu.pipeline_mode<synchronous>, transform_indices = @transform_4, window_bounds = array<i64: 128, 64>}, {pipeline_mode = #tpu.pipeline_mode<synchronous>, transform_indices = @transform_5, window_bounds = array<i64: 1, 64>}, {pipeline_mode = #tpu.pipeline_mode<synchronous>, transform_indices = @transform_6, window_bounds = array<i64: 64, 128>}, {pipeline_mode = #tpu.pipeline_mode<synchronous>, transform_indices = @transform_7, window_bounds = array<i64: 1, 128>}, {pipeline_mode = #tpu.pipeline_mode<synchronous>, transform_indices = @transform_8, window_bounds = array<i64: 8, 64>}, {pipeline_mode = #tpu.pipeline_mode<synchronous>, transform_indices = @transform_9, window_bounds = array<i64: 1, 64>}, {pipeline_mode = #tpu.pipeline_mode<synchronous>, transform_indices = @transform_10, window_bounds = array<i64: 64, 128>}, {pipeline_mode = #tpu.pipeline_mode<synchronous>, transform_indices = @transform_11, window_bounds = array<i64: 1, 128>}, {pipeline_mode = #tpu.pipeline_mode<synchronous>, transform_indices = @transform_12, window_bounds = array<i64: 128, 128>}, {pipeline_mode = #tpu.pipeline_mode<synchronous>, transform_indices = @transform_13, window_bounds = array<i64: 1, 128>}, {transform_indices = @transform_14, window_bounds = array<i64: 8, 128>}]} {
    %c0 = arith.constant 0 : index
    %c0_0 = arith.constant 0 : index
    %0 = vector.load %arg1[%c0, %c0_0] : memref<8x32xf32, #tpu.memory_space<vmem>>, vector<8x32xf32>
    %c0_1 = arith.constant 0 : index
    %c0_2 = arith.constant 0 : index
    %1 = vector.load %arg3[%c0_1, %c0_2] : memref<32x128xf32, #tpu.memory_space<vmem>>, vector<32x128xf32>
    %cst = arith.constant dense<0.000000e+00> : vector<8x128xf32>
    %2 = tpu.matmul %0, %1, %cst {dimension_numbers = #tpu.dot_dimension_numbers<[1], [0], [0], [1], [0, 0, 1, 1], [], []>} : vector<8x32xf32>, vector<32x128xf32>, vector<8x128xf32> -> vector<8x128xf32>
    %c0_3 = arith.constant 0 : index
    %c0_4 = arith.constant 0 : index
    %3 = vector.load %arg4[%c0_3, %c0_4] : memref<1x128xf32, #tpu.memory_space<vmem>>, vector<1x128xf32>
    %4 = vector.broadcast %3 : vector<1x128xf32> to vector<8x128xf32>
    %5 = arith.addf %2, %4 : vector<8x128xf32>
    %cst_5 = arith.constant 0.000000e+00 : f32
    %6 = vector.broadcast %cst_5 : f32 to vector<8x128xf32>
    %7 = arith.maximumf %5, %6 : vector<8x128xf32>
    %c0_6 = arith.constant 0 : index
    %c0_7 = arith.constant 0 : index
    %8 = vector.load %arg5[%c0_6, %c0_7] : memref<128x64xf32, #tpu.memory_space<vmem>>, vector<128x64xf32>
    %cst_8 = arith.constant dense<0.000000e+00> : vector<8x64xf32>
    %9 = tpu.matmul %7, %8, %cst_8 {dimension_numbers = #tpu.dot_dimension_numbers<[1], [0], [0], [1], [0, 0, 1, 1], [], []>} : vector<8x128xf32>, vector<128x64xf32>, vector<8x64xf32> -> vector<8x64xf32>
    %c0_9 = arith.constant 0 : index
    %c0_10 = arith.constant 0 : index
    %10 = vector.load %arg6[%c0_9, %c0_10] : memref<1x64xf32, #tpu.memory_space<vmem>>, vector<1x64xf32>
    %11 = vector.broadcast %10 : vector<1x64xf32> to vector<8x64xf32>
    %12 = arith.addf %9, %11 : vector<8x64xf32>
    %cst_11 = arith.constant 0.000000e+00 : f32
    %13 = vector.broadcast %cst_11 : f32 to vector<8x64xf32>
    %14 = arith.maximumf %12, %13 : vector<8x64xf32>
    %c0_12 = arith.constant 0 : index
    %c0_13 = arith.constant 0 : index
    %15 = vector.load %arg7[%c0_12, %c0_13] : memref<64x128xf32, #tpu.memory_space<vmem>>, vector<64x128xf32>
    %cst_14 = arith.constant dense<0.000000e+00> : vector<8x128xf32>
    %16 = tpu.matmul %14, %15, %cst_14 {dimension_numbers = #tpu.dot_dimension_numbers<[1], [0], [0], [1], [0, 0, 1, 1], [], []>} : vector<8x64xf32>, vector<64x128xf32>, vector<8x128xf32> -> vector<8x128xf32>
    %c0_15 = arith.constant 0 : index
    %c0_16 = arith.constant 0 : index
    %17 = vector.load %arg8[%c0_15, %c0_16] : memref<1x128xf32, #tpu.memory_space<vmem>>, vector<1x128xf32>
    %18 = vector.broadcast %17 : vector<1x128xf32> to vector<8x128xf32>
    %19 = arith.addf %16, %18 : vector<8x128xf32>
    %20 = vector.extract_strided_slice %19 {offsets = [0, 32], sizes = [8, 8], strides = [1, 1]} : vector<8x128xf32> to vector<8x8xf32>
    %21 = vector.extract_strided_slice %19 {offsets = [0, 40], sizes = [8, 8], strides = [1, 1]} : vector<8x128xf32> to vector<8x8xf32>
    %c0_17 = arith.constant 0 : index
    %c0_18 = arith.constant 0 : index
    %22 = vector.load %arg2[%c0_17, %c0_18] : memref<8x8xf32, #tpu.memory_space<vmem>>, vector<8x8xf32>
    %cst_19 = arith.constant 5.000000e-01 : f32
    %23 = vector.broadcast %cst_19 : f32 to vector<8x8xf32>
    %24 = arith.mulf %23, %21 : vector<8x8xf32>
    %25 = math.exp %24 : vector<8x8xf32>
    %26 = arith.mulf %22, %25 : vector<8x8xf32>
    %27 = arith.addf %20, %26 : vector<8x8xf32>
    %c0_20 = arith.constant 0 : index
    %c0_21 = arith.constant 0 : index
    %28 = vector.load %arg9[%c0_20, %c0_21] : memref<8x64xf32, #tpu.memory_space<vmem>>, vector<8x64xf32>
    %cst_22 = arith.constant dense<0.000000e+00> : vector<8x64xf32>
    %29 = tpu.matmul %27, %28, %cst_22 {dimension_numbers = #tpu.dot_dimension_numbers<[1], [0], [0], [1], [0, 0, 1, 1], [], []>} : vector<8x8xf32>, vector<8x64xf32>, vector<8x64xf32> -> vector<8x64xf32>
    %c0_23 = arith.constant 0 : index
    %c0_24 = arith.constant 0 : index
    %30 = vector.load %arg10[%c0_23, %c0_24] : memref<1x64xf32, #tpu.memory_space<vmem>>, vector<1x64xf32>
    %31 = vector.broadcast %30 : vector<1x64xf32> to vector<8x64xf32>
    %32 = arith.addf %29, %31 : vector<8x64xf32>
    %cst_25 = arith.constant 0.000000e+00 : f32
    %33 = vector.broadcast %cst_25 : f32 to vector<8x64xf32>
    %34 = arith.maximumf %32, %33 : vector<8x64xf32>
    %c0_26 = arith.constant 0 : index
    %c0_27 = arith.constant 0 : index
    %35 = vector.load %arg11[%c0_26, %c0_27] : memref<64x128xf32, #tpu.memory_space<vmem>>, vector<64x128xf32>
    %cst_28 = arith.constant dense<0.000000e+00> : vector<8x128xf32>
    %36 = tpu.matmul %34, %35, %cst_28 {dimension_numbers = #tpu.dot_dimension_numbers<[1], [0], [0], [1], [0, 0, 1, 1], [], []>} : vector<8x64xf32>, vector<64x128xf32>, vector<8x128xf32> -> vector<8x128xf32>
    %c0_29 = arith.constant 0 : index
    %c0_30 = arith.constant 0 : index
    %37 = vector.load %arg12[%c0_29, %c0_30] : memref<1x128xf32, #tpu.memory_space<vmem>>, vector<1x128xf32>
    %38 = vector.broadcast %37 : vector<1x128xf32> to vector<8x128xf32>
    %39 = arith.addf %36, %38 : vector<8x128xf32>
    %cst_31 = arith.constant 0.000000e+00 : f32
    %40 = vector.broadcast %cst_31 : f32 to vector<8x128xf32>
    %41 = arith.maximumf %39, %40 : vector<8x128xf32>
    %c0_32 = arith.constant 0 : index
    %c0_33 = arith.constant 0 : index
    %42 = vector.load %arg13[%c0_32, %c0_33] : memref<128x128xf32, #tpu.memory_space<vmem>>, vector<128x128xf32>
    %cst_34 = arith.constant dense<0.000000e+00> : vector<8x128xf32>
    %43 = tpu.matmul %41, %42, %cst_34 {dimension_numbers = #tpu.dot_dimension_numbers<[1], [0], [0], [1], [0, 0, 1, 1], [], []>} : vector<8x128xf32>, vector<128x128xf32>, vector<8x128xf32> -> vector<8x128xf32>
    %c0_35 = arith.constant 0 : index
    %c0_36 = arith.constant 0 : index
    %44 = vector.load %arg14[%c0_35, %c0_36] : memref<1x128xf32, #tpu.memory_space<vmem>>, vector<1x128xf32>
    %45 = vector.broadcast %44 : vector<1x128xf32> to vector<8x128xf32>
    %46 = arith.addf %43, %45 : vector<8x128xf32>
    %47 = arith.addf %46, %19 : vector<8x128xf32>
    %c0_37 = arith.constant 0 : index
    %c0_38 = arith.constant 0 : index
    %48 = vector.load %arg15[%c0_37, %c0_38] : memref<8x128xf32, #tpu.memory_space<vmem>>, vector<8x128xf32>
    tpu.vector_store %arg15[%c0_37, %c0_38], %47 {strides = array<i32>} : memref<8x128xf32, #tpu.memory_space<vmem>>, vector<8x128xf32>,
    return
  }
  func.func @transform_0(%arg0: i32) -> (i32, i32) {
    %c0_i32 = arith.constant 0 : i32
    %c0_i32_0 = arith.constant 0 : i32
    return %arg0, %c0_i32 : i32, i32
  }
  func.func @transform_1(%arg0: i32) -> (i32, i32) {
    %c0_i32 = arith.constant 0 : i32
    %c0_i32_0 = arith.constant 0 : i32
    return %arg0, %c0_i32 : i32, i32
  }
  func.func @transform_2(%arg0: i32) -> (i32, i32) {
    %c0_i32 = arith.constant 0 : i32
    %c0_i32_0 = arith.constant 0 : i32
    %c0_i32_1 = arith.constant 0 : i32
    return %c0_i32, %c0_i32_0 : i32, i32
  }
  func.func @transform_3(%arg0: i32) -> (i32, i32) {
    %c0_i32 = arith.constant 0 : i32
    %c0_i32_0 = arith.constant 0 : i32
    %c0_i32_1 = arith.constant 0 : i32
    return %c0_i32, %c0_i32_0 : i32, i32
  }
  func.func @transform_4(%arg0: i32) -> (i32, i32) {
    %c0_i32 = arith.constant 0 : i32
    %c0_i32_0 = arith.constant 0 : i32
    %c0_i32_1 = arith.constant 0 : i32
    return %c0_i32, %c0_i32_0 : i32, i32
  }
  func.func @transform_5(%arg0: i32) -> (i32, i32) {
    %c0_i32 = arith.constant 0 : i32
    %c0_i32_0 = arith.constant 0 : i32
    %c0_i32_1 = arith.constant 0 : i32
    return %c0_i32, %c0_i32_0 : i32, i32
  }
  func.func @transform_6(%arg0: i32) -> (i32, i32) {
    %c0_i32 = arith.constant 0 : i32
    %c0_i32_0 = arith.constant 0 : i32
    %c0_i32_1 = arith.constant 0 : i32
    return %c0_i32, %c0_i32_0 : i32, i32
  }
  func.func @transform_7(%arg0: i32) -> (i32, i32) {
    %c0_i32 = arith.constant 0 : i32
    %c0_i32_0 = arith.constant 0 : i32
    %c0_i32_1 = arith.constant 0 : i32
    return %c0_i32, %c0_i32_0 : i32, i32
  }
  func.func @transform_8(%arg0: i32) -> (i32, i32) {
    %c0_i32 = arith.constant 0 : i32
    %c0_i32_0 = arith.constant 0 : i32
    %c0_i32_1 = arith.constant 0 : i32
    return %c0_i32, %c0_i32_0 : i32, i32
  }
  func.func @transform_9(%arg0: i32) -> (i32, i32) {
    %c0_i32 = arith.constant 0 : i32
    %c0_i32_0 = arith.constant 0 : i32
    %c0_i32_1 = arith.constant 0 : i32
    return %c0_i32, %c0_i32_0 : i32, i32
  }
  func.func @transform_10(%arg0: i32) -> (i32, i32) {
    %c0_i32 = arith.constant 0 : i32
    %c0_i32_0 = arith.constant 0 : i32
    %c0_i32_1 = arith.constant 0 : i32
    return %c0_i32, %c0_i32_0 : i32, i32
  }
  func.func @transform_11(%arg0: i32) -> (i32, i32) {
    %c0_i32 = arith.constant 0 : i32
    %c0_i32_0 = arith.constant 0 : i32
    %c0_i32_1 = arith.constant 0 : i32
    return %c0_i32, %c0_i32_0 : i32, i32
  }
  func.func @transform_12(%arg0: i32) -> (i32, i32) {
    %c0_i32 = arith.constant 0 : i32
    %c0_i32_0 = arith.constant 0 : i32
    %c0_i32_1 = arith.constant 0 : i32
    return %c0_i32, %c0_i32_0 : i32, i32
  }
  func.func @transform_13(%arg0: i32) -> (i32, i32) {
    %c0_i32 = arith.constant 0 : i32
    %c0_i32_0 = arith.constant 0 : i32
    %c0_i32_1 = arith.constant 0 : i32
    return %c0_i32, %c0_i32_0 : i32, i32
  }
  func.func @transform_14(%arg0: i32) -> (i32, i32) {
    %c0_i32 = arith.constant 0 : i32
    %c0_i32_0 = arith.constant 0 : i32
    return %arg0, %c0_i32 : i32, i32
  }
}

</mosaic_0001>

<bundles_post_ra>
// kernel: vae_forward.1
= control target key start
LH: loop header
LB: loop body
LE: loop exit
PB: predicated region body
PF: predicated region fallthrough
CT: control target
= control target key end

     0   :  { %19 = vsyncpa [#allocation3], 0  ;;  %s1369_s0 = inlined_call_operand.vmem [shape: f32[8,32], index: 0, kind: input, shape index: {}]   ;;  %s1370_s1 = inlined_call_operand.hbm [shape: f32[8,8], index: 1, kind: input, shape index: {}]   ;;  %s1371_s2 = inlined_call_operand.vmem [shape: f32[32,128], index: 2, kind: input, shape index: {}]   ;;  %s1372_s3 = inlined_call_operand.vmem [shape: f32[1,128], index: 3, kind: input, shape index: {}]   ;;  %s1373_s4 = inlined_call_operand.vmem [shape: f32[128,64], index: 4, kind: input, shape index: {}]   ;;  %s1374_s5 = inlined_call_operand.vmem [shape: f32[1,64], index: 5, kind: input, shape index: {}]   ;;  %s1375_s6 = inlined_call_operand.vmem [shape: f32[64,128], index: 6, kind: input, shape index: {}]   ;;  %s1376_s7 = inlined_call_operand.vmem [shape: f32[1,128], index: 7, kind: input, shape index: {}]   ;;  %s1377_s8 = inlined_call_operand.hbm [shape: f32[8,64], index: 8, kind: input, shape index: {}]   ;;  %s1378_s9 = inlined_call_operand.vmem [shape: f32[1,64], index: 9, kind: input, shape index: {}]   ;;  %s1379_s10 = inlined_call_operand.hbm [shape: f32[64,128], index: 10, kind: input, shape index: {}]   ;;  %s1380_s11 = inlined_call_operand.vmem [shape: f32[1,128], index: 11, kind: input, shape index: {}]   ;;  %s1381_s12 = inlined_call_operand.vmem [shape: f32[128,128], index: 12, kind: input, shape index: {}]   ;;  %s1382_s13 = inlined_call_operand.hbm [shape: f32[1,128], index: 13, kind: input, shape index: {}]   ;;  %s1383_s14 = inlined_call_operand.vmem [shape: f32[8,128], index: 14, kind: output, shape index: {}]  }
   0x1   :  { %20 = vsyncpa [#allocation5], 0 }
   0x2   :  { %21 = vsyncpa [#allocation8], 0  ;;  %s1035_s29 = smov [#allocation4]   ;;  %s1036_s15 = smov [#allocation2]  }
   0x3   :  { %s52_s30 = sshll.u32 %s1035_s29, 4  ;;  %s30_s16 = sshll.u32 %s1036_s15, 4  ;;  %s53_s30 = int_to_ptr.vmem [resolvable:$true] %s52_s30  ;;  %s31_s16 = int_to_ptr.vmem [resolvable:$true] %s30_s16 }
   0x4   :  { %s941_s19 = scalar_lea.hbm %s1377_s8, 128 }
   0x5   :  { %p942_p0 = scmp.ne.s32.totalorder %s1377_s8, %s941_s19  ;;  %p945_p1 = scmp.lt.u32.totalorder %s941_s19, %s1377_s8 }
   0x7   :  { %p947_p2 = pnand %p945_p1, %p942_p0 }
   0x9   :  { %950 = shalt.err (!%p947_p2)
}
   0xa   :  { %s951_s24 = scalar_lea.vmem %s53_s30, 128  ;;  %p956_p4 = scmp.lt.s32.totalorder %s53_s30, %s53_s30 }
   0xb   :  { %p952_p3 = scmp.ne.s32.totalorder %s53_s30, %s951_s24  ;;  %p957_p5 = scmp.lt.s32.totalorder %s951_s24, %s951_s24 }
   0xd   :  { %p958_p6 = por %p957_p5, %p956_p4 }
   0xf   :  { %p959_p7 = pnand %p958_p6, %p952_p3 }
  0x11   :  { %962 = shalt.err (!%p959_p7)
}
  0x12   :  { %55 = dma.hbm_to_vmem [thread:$0]  %s1377_s8, 128, %s53_s30, [#allocation5]  }
  0x13   :  { %s963_s29 = scalar_lea.hbm %s1370_s1, 128 }
  0x14   :  { %p964_p8 = scmp.ne.s32.totalorder %s1370_s1, %s963_s29  ;;  %p967_p9 = scmp.lt.u32.totalorder %s963_s29, %s1370_s1 }
  0x16   :  { %p969_p10 = pnand %p967_p9, %p964_p8 }
  0x18   :  { %972 = shalt.err (!%p969_p10)
}
  0x19   :  { %s973_s20 = scalar_lea.vmem %s31_s16, 128  ;;  %p978_p12 = scmp.lt.s32.totalorder %s31_s16, %s31_s16 }
  0x1a   :  { %p974_p11 = scmp.ne.s32.totalorder %s31_s16, %s973_s20  ;;  %p979_p13 = scmp.lt.s32.totalorder %s973_s20, %s973_s20 }
  0x1c   :  { %p980_p0 = por %p979_p13, %p978_p12 }
  0x1e   :  { %p981_p1 = pnand %p980_p0, %p974_p11 }
  0x20   :  { %984 = shalt.err (!%p981_p1)
}
  0x21   :  { %33 = dma.hbm_to_vmem [thread:$0]  %s1370_s1, 128, %s31_s16, [#allocation3]  }
  0x22   :  { %s1037_s21 = smov [#allocation6]   ;;  %s985_s25 = scalar_lea.hbm %s1379_s10, 1024 }
  0x23   :  { %s63_s22 = sshll.u32 %s1037_s21, 4  ;;  %p986_p2 = scmp.ne.s32.totalorder %s1379_s10, %s985_s25  ;;  %s64_s22 = int_to_ptr.vmem [resolvable:$true] %s63_s22 }
  0x24   :  { %p989_p3 = scmp.lt.u32.totalorder %s985_s25, %s1379_s10 }
  0x26   :  { %p991_p4 = pnand %p989_p3, %p986_p2 }
  0x28   :  { %994 = shalt.err (!%p991_p4)
}
  0x29   :  { %s995_s15 = scalar_lea.vmem %s64_s22, 1024  ;;  %p1000_p6 = scmp.lt.s32.totalorder %s64_s22, %s64_s22 }
  0x2a   :  { %p996_p5 = scmp.ne.s32.totalorder %s64_s22, %s995_s15  ;;  %p1001_p7 = scmp.lt.s32.totalorder %s995_s15, %s995_s15 }
  0x2c   :  { %p1002_p8 = por %p1001_p7, %p1000_p6 }
  0x2e   :  { %p1003_p9 = pnand %p1002_p8, %p996_p5 }
  0x30   :  { %1006 = shalt.err (!%p1003_p9)
}
  0x31   :  { %s1038_s1 = smov 128   ;;  %s1039_s16 = smov 8  }
  0x32   :  { %69 = dma.hbm_to_vmem [thread:$0]  %s1379_s10, 1024, %s64_s22, [#allocation5], %s1038_s1, %s1038_s1, %s1039_s16  }
  0x33   :  { %s1040_s19 = smov [#allocation7]   ;;  %s1007_s21 = scalar_lea.hbm %s1382_s13, 16 }
  0x34   :  { %s80_s20 = sshll.u32 %s1040_s19, 4  ;;  %p1008_p10 = scmp.ne.s32.totalorder %s1382_s13, %s1007_s21  ;;  %s81_s20 = int_to_ptr.vmem [resolvable:$true] %s80_s20 }
  0x35   :  { %p1011_p11 = scmp.lt.u32.totalorder %s1007_s21, %s1382_s13 }
  0x37   :  { %p1013_p12 = pnand %p1011_p11, %p1008_p10 }
  0x39   :  { %1016 = shalt.err (!%p1013_p12)
}
  0x3a   :  { %s1017_s27 = scalar_lea.vmem %s81_s20, 16  ;;  %s1021_s10 = scalar_lea.vmem %s81_s20, 32 }
  0x3b   :  { %p1018_p13 = scmp.ne.s32.totalorder %s81_s20, %s1017_s27  ;;  %p1022_p0 = scmp.lt.s32.totalorder %s81_s20, %s81_s20 }
  0x3c   :  { %p1023_p1 = scmp.lt.s32.totalorder %s1021_s10, %s1017_s27 }
  0x3e   :  { %p1024_p2 = por %p1023_p1, %p1022_p0 }
  0x40   :  { %p1025_p3 = pnand %p1024_p2, %p1018_p13 }
  0x42   :  { %1028 = shalt.err (!%p1025_p3)
}
  0x43   :  { %83 = dma.hbm_to_vmem [thread:$0]  %s1382_s13, 16, %s81_s20, [#allocation8]  }
  0x44   :  { %1029 = dma.done.wait [#allocation3], 128  }
  0x45   :  { %1030 = vsyncadd [#allocation3], 4294967168 }
  0x46   :  { %1031 = dma.done.wait [#allocation5], 1152  }
  0x47   :  { %1032 = vsyncadd [#allocation5], 4294966144 }
  0x48   :  { %1033 = dma.done.wait [#allocation8], 16  }
  0x49   :  { %1034 = vsyncadd [#allocation8], 4294967280  ;;  %v1041_v0 = vmov 0.0|0.0   ;;  %vm1042_vm0 = vmmov 0   ;;  %v1043_v1 = vmov 0.0   ;;  %v97_v2 = vld [vmem:[%s1371_s2] sm:$0xff] }
  0x4a   :  { %849 = vmatprep.subr.bf16.mxu0 %v1041_v0  ;;  %733 = vmatprep.mubr.msk.f32.mxu0 %vm1042_vm0, %v1043_v1  ;;  %v98_v3 = vld [vmem:[%s1371_s2 + $0x8] sm:$0xff]  ;;  %v99_v4 = vld [vmem:[%s1371_s2 + $0x10] sm:$0xff]  ;;  %v100_v6 = vld [vmem:[%s1371_s2 + $0x18] sm:$0xff]  ;;  %vm108_vm1 = vcmask 261120   ;;  %vm292_vm2 = vcmask 523264   ;;  %s1045_s27 = smov 32  }
  0x4b   :  { %855 = vmatprep.subr.bf16.mxu1 %v1041_v0  ;;  %768 = vmatprep.mubr.msk.f32.mxu1 %vm1042_vm0, %v1043_v1  ;;  %v850_v5 = vpack.c.bf16 %v98_v3, %v97_v2  ;;  %v183_v7 = vld [vmem:[%s1373_s4] sm:$0xff]  ;;  %v184_v8 = vld [vmem:[%s1373_s4 + $0x8] sm:$0xff]  ;;  %v185_v9 = vld [vmem:[%s1373_s4 + $0x10] sm:$0xff]  ;;  %v853_v11 = vpack.c.bf16 %v100_v6, %v99_v4  ;;  %vm391_vm3 = vcmask 64512  }
  0x4c   :  { %v186_v10 = vld [vmem:[%s1373_s4 + $0x18] sm:$0xff]  ;;  %v856_v12 = vpack.c.bf16 %v184_v8, %v183_v7  ;;  %v187_v14 = vld [vmem:[%s1373_s4 + $0x20] sm:$0xff]  ;;  %v188_v15 = vld [vmem:[%s1373_s4 + $0x28] sm:$0xff] }
  0x4d   :  { %851 = vmatpush3.bf16.msra.mxu0 %v850_v5  ;;  %v859_v13 = vpack.c.bf16 %v186_v10, %v185_v9  ;;  %v96_v16 = vld [vmem:[%s1369_s0] sm:$0xff]  ;;  %v862_v17 = vpack.c.bf16 %v188_v15, %v187_v14  ;;  %v189_v18 = vld [vmem:[%s1373_s4 + $0x30] sm:$0xff]  ;;  %v190_v19 = vld [vmem:[%s1373_s4 + $0x38] sm:$0xff] }
  0x4e   :  { %852 = vmatprep.subr.bf16.mxu0 %v1041_v0  ;;  %857 = vmatpush3.bf16.msra.mxu1 %v856_v12  ;;  %v865_v20 = vpack.c.bf16 %v190_v19, %v189_v18  ;;  %v191_v21 = vld [vmem:[%s1373_s4 + $0x40] sm:$0xff]  ;;  %v192_v22 = vld [vmem:[%s1373_s4 + $0x48] sm:$0xff]  ;;  %v193_v24 = vld [vmem:[%s1373_s4 + $0x50] sm:$0xff] }
  0x4f   :  { %858 = vmatprep.subr.bf16.mxu1 %v1041_v0  ;;  %v868_v23 = vpack.c.bf16 %v192_v22, %v191_v21  ;;  %v194_v25 = vld [vmem:[%s1373_s4 + $0x58] sm:$0xff]  ;;  %v195_v27 = vld [vmem:[%s1373_s4 + $0x60] sm:$0xff]  ;;  %v196_v28 = vld [vmem:[%s1373_s4 + $0x68] sm:$0xff] }
  0x50   :  { %v871_v26 = vpack.c.bf16 %v194_v25, %v193_v24  ;;  %v874_v29 = vpack.c.bf16 %v196_v28, %v195_v27  ;;  %v197_v30 = vld [vmem:[%s1373_s4 + $0x70] sm:$0xff]  ;;  %v198_v31 = vld [vmem:[%s1373_s4 + $0x78] sm:$0xff]  ;;  %v277_v33 = vld [vmem:[%s1375_s6] sm:$0xff] }
  0x51   :  { %854 = vmatpush3.bf16.msra.mxu0 %v853_v11  ;;  %v877_v32 = vpack.c.bf16 %v198_v31, %v197_v30  ;;  %v278_v34 = vld [vmem:[%s1375_s6 + $0x8] sm:$0xff]  ;;  %v279_v35 = vld [vmem:[%s1375_s6 + $0x10] sm:$0xff]  ;;  %v280_v37 = vld [vmem:[%s1375_s6 + $0x18] sm:$0xff] }
  0x52   :  { %879 = vmatprep.subr.bf16.mxu0 %v1041_v0  ;;  %860 = vmatpush3.bf16.msra.mxu1 %v859_v13  ;;  %v880_v36 = vpack.c.bf16 %v278_v34, %v277_v33  ;;  %v883_v38 = vpack.c.bf16 %v280_v37, %v279_v35  ;;  %v281_v39 = vld [vmem:[%s1375_s6 + $0x20] sm:$0xff]  ;;  %v282_v40 = vld [vmem:[%s1375_s6 + $0x28] sm:$0xff]  ;;  %v283_v47 = vld [vmem:[%s1375_s6 + $0x30] sm:$0xff] }
  0x53   :  { %861 = vmatprep.subr.bf16.mxu1 %v1041_v0  ;;  %v886_v41 = vpack.c.bf16 %v282_v40, %v281_v39  ;;  %v656_v42 = vld [vmem:[%s1372_s3] ss:$0 sm:$0xff]  ;;  %v284_v48 = vld [vmem:[%s1375_s6 + $0x38] sm:$0xff]  ;;  %v380_v62 = vld [vmem:[#allocation4] sm:$0xff] }
  0x54   :  { %734 = vmatmul.mubr.msk.f32.vlgmr.msra.gmra.mrb[0].mxu0 %vm108_vm1, %v96_v16  ;;  %v889_v49 = vpack.c.bf16 %v284_v48, %v283_v47  ;;  %v658_v50 = vld [vmem:[%s1374_s5] ss:$0 sm:$0xff]  ;;  %s1044_s5 = smov 88   ;;  %v465_v6 = vld [vmem:[#allocation6] sm:$0xff]  ;;  %v466_v7 = vld [vmem:[#allocation6 + $0x8] sm:$0xff] }
  0x55   :  { %787 = vmatprep.mubr.msk.f32.mxu0 %vm1042_vm0, %v1043_v1  ;;  %881 = vmatpush3.bf16.msra.mxu0 %v880_v36  ;;  %v659_v55 = vld [vmem:[%s1376_s7] ss:$0 sm:$0xff]  ;;  %s1046_s7 = smov 96   ;;  %v892_v8 = vpack.c.bf16 %v466_v7, %v465_v6  ;;  %v468_v10 = vld [vmem:[#allocation6 + $0x18] sm:$0xff]  ;;  %v469_v13 = vld [vmem:[#allocation6 + $0x20] sm:$0xff] }
  0x56   :  { %863 = vmatpush3.bf16.msra.mxu1 %v862_v17  ;;  %882 = vmatprep.subr.bf16.mxu0 %v1041_v0  ;;  %v366_v63 = vld [vmem:[#allocation2] sm:$0xff]  ;;  %v470_v14 = vld [vmem:[#allocation6 + $0x28] sm:$0xff]  ;;  %v472_v17 = vld [vmem:[#allocation6 + $0x38] sm:$0xff] }
  0x57   :  { %864 = vmatprep.subr.bf16.mxu1 %v1041_v0  ;;  %v467_v9 = vld [vmem:[#allocation6 + $0x10] sm:$0xff]  ;;  %v898_v15 = vpack.c.bf16 %v470_v14, %v469_v13  ;;  %v557_v22 = vld [vmem:[%s1381_s12 + $0x18] sm:$0xff]  ;;  %v559_v25 = vld [vmem:[%s1381_s12 + $0x28] sm:$0xff] }
  0x58   :  { %v895_v12 = vpack.c.bf16 %v468_v10, %v467_v9  ;;  %v471_v16 = vld [vmem:[#allocation6 + $0x30] sm:$0xff]  ;;  %v560_v27 = vld [vmem:[%s1381_s12 + $0x30] sm:$0xff]  ;;  %v561_v28 = vld [vmem:[%s1381_s12 + $0x38] sm:$0xff] }
  0x59   :  { %884 = vmatpush3.bf16.msra.mxu0 %v883_v38  ;;  %v901_v18 = vpack.c.bf16 %v472_v17, %v471_v16  ;;  %v554_v19 = vld [vmem:[%s1381_s12] sm:$0xff]  ;;  %v563_v31 = vld [vmem:[%s1381_s12 + $0x48] sm:$0xff]  ;;  %v564_v33 = vld [vmem:[%s1381_s12 + $0x50] sm:$0xff] }
  0x5a   :  { %866 = vmatpush3.bf16.msra.mxu1 %v865_v20  ;;  %885 = vmatprep.subr.bf16.mxu0 %v1041_v0  ;;  %v556_v20 = vld [vmem:[%s1381_s12 + $0x10] sm:$0xff]  ;;  %v558_v24 = vld [vmem:[%s1381_s12 + $0x20] sm:$0xff]  ;;  %v565_v34 = vld [vmem:[%s1381_s12 + $0x58] sm:$0xff] }
  0x5b   :  { %867 = vmatprep.subr.bf16.mxu1 %v1041_v0  ;;  %v562_v30 = vld [vmem:[%s1381_s12 + $0x40] sm:$0xff]  ;;  %v919_v35 = vpack.c.bf16 %v565_v34, %v564_v33  ;;  %v567_v37 = vld [vmem:[%s1381_s12 + $0x68] sm:$0xff] }
  0x5c   :  { %v566_v36 = vld [vmem:[%s1381_s12 + $0x60] sm:$0xff] }
  0x5d   :  { %887 = vmatpush3.bf16.msra.mxu0 %v886_v41  ;;  %v922_v38 = vpack.c.bf16 %v567_v37, %v566_v36  ;;  %v661_v39 = vld [vmem:[%s1378_s9] ss:$0 sm:$0xff] }
  0x5e   :  { %869 = vmatpush3.bf16.msra.mxu1 %v868_v23  ;;  %888 = vmatprep.subr.bf16.mxu0 %v1041_v0  ;;  %v907_v23 = vpack.c.bf16 %v557_v22, %v556_v20 }
  0x5f   :  { %870 = vmatprep.subr.bf16.mxu1 %v1041_v0 }
  0x61   :  { %890 = vmatpush3.bf16.msra.mxu0 %v889_v49 }
  0x62   :  { %872 = vmatpush3.bf16.msra.mxu1 %v871_v26  ;;  %790 = vmatprep.subr.mxu0 %v1043_v1  ;;  %v910_v26 = vpack.c.bf16 %v559_v25, %v558_v24 }
  0x63   :  { %873 = vmatprep.subr.bf16.mxu1 %v1041_v0 }
  0x66   :  { %875 = vmatpush3.bf16.msra.mxu1 %v874_v29  ;;  %v913_v29 = vpack.c.bf16 %v561_v28, %v560_v27 }
  0x67   :  { %876 = vmatprep.subr.bf16.mxu1 %v1041_v0 }
  0x6a   :  { %878 = vmatpush3.bf16.msra.mxu1 %v877_v32  ;;  %v916_v32 = vpack.c.bf16 %v563_v31, %v562_v30 }
  0x6b   :  { %903 = vmatprep.subr.bf16.mxu1 %v1041_v0 }
 0x127   :  { %v178_v43 = vpop.f32.mrb[0].mxu0 }
 0x128   :  { %v179_v44 = vadd.f32 %v656_v42, %v178_v43  ;;  %v735_v45 = vpop.f32.mrb[1].mxu0 }
 0x129   :  { %v569_v45 = vld [vmem:[%s1381_s12 + $0x78] sm:$0xff] }
 0x12a   :  { %v182_v46 = vmax.f32 %v179_v44, 0.0  ;;  %v568_v44 = vld [vmem:[%s1381_s12 + $0x70] sm:$0xff] }
 0x12c   :  { %769 = vmatmul.mubr.f32.vlgmr.msra.gmra.mrb[0].mxu1 %v182_v46  ;;  %v925_v46 = vpack.c.bf16 %v569_v45, %v568_v44 }
 0x12d   :  { %846 = vmatprep.mubr.msk.f32.mxu1 %vm1042_vm0, %v1043_v1 }
 0x1ff   :  { %v272_v51 = vpop.f32.mrb[0].mxu1 }
 0x200   :  { %v273_v52 = vadd.f32 %v658_v50, %v272_v51  ;;  %v770_v53 = vpop.f32.mrb[1].mxu1  ;;  %v665_v51 = vld [vmem:[#allocation7] ss:$0 sm:$0xff] }
 0x202   :  { %v276_v54 = vmax.f32 %v273_v52, 0.0 }
 0x204   :  { %788 = vmatmul.mubr.msk.f32.vlgmr.msra.gmra.mrb[2].mxu0 %vm292_vm2, %v276_v54 }
 0x205   :  { %792 = vmatprep.mubr.msk.f32.mxu0 %vm1042_vm0, %v1043_v1  ;;  %791 = vmatpush3.msra.mxu0 %v380_v62 }
 0x206   :  { %891 = vmatprep.subr.bf16.mxu0 %v1041_v0 }
 0x2d7   :  { %v362_v56 = vpop.f32.mrb[2].mxu0 }
 0x2d8   :  { %v1293_v57 = vadd.f32 %v659_v55, %v362_v56  ;;  %v789_v58 = vpop.f32.mrb[3].mxu0 }
 0x2da   :  { %v367_v59 = vmul.f32 0.5, %v1293_v57 }
 0x2dc   :  { %v368_v60 = vmul.f32 1.442695, %v367_v59 }
 0x2de   :  { %939 = vpow2.f32 %v368_v60 }
 0x2e8   :  { %v940_v61 = vpop.eup %939 }
 0x2e9   :  { %371 = vrot.lane.b32.xlu0 %v940_v61, %s1044_s5 }
 0x35b   :  { %v372_v2 = vpop.permute.xlu0 %371 }
 0x35c   :  { %v374_v3 = vmul.f32 %v372_v2, %v366_v63 }
 0x35e   :  { %376 = vrot.lane.b32.xlu0 %v374_v3, %s1045_s27 }
 0x3d0   :  { %v377_v4 = vpop.permute.xlu0 %376 }
 0x3d1   :  { %v379_v5 = vadd.f32 %v377_v4, %v1293_v57 }
 0x3d3   :  { %389 = vrot.lane.b32.xlu1 %v379_v5, %s1046_s7 }
 0x445   :  { %v390_v11 = vpop.permute.xlu1 %389 }
 0x446   :  { %793 = vmatmul.mubr.msk.f32.vlgmr.msra.gmra.mrb[4].mxu0 %vm391_vm3, %v390_v11 }
 0x447   :  { %893 = vmatpush3.bf16.msra.mxu0 %v892_v8  ;;  %811 = vmatprep.mubr.msk.f32.mxu0 %vm1042_vm0, %v1043_v1  ;;  %v555_v1 = vld [vmem:[%s1381_s12 + $0x8] sm:$0xff] }
 0x448   :  { %894 = vmatprep.subr.bf16.mxu0 %v1041_v0  ;;  %v904_v21 = vpack.c.bf16 %v555_v1, %v554_v19 }
 0x44a   :  { %905 = vmatpush3.bf16.msra.mxu1 %v904_v21 }
 0x44b   :  { %896 = vmatpush3.bf16.msra.mxu0 %v895_v12  ;;  %906 = vmatprep.subr.bf16.mxu1 %v1041_v0 }
 0x44c   :  { %897 = vmatprep.subr.bf16.mxu0 %v1041_v0 }
 0x44e   :  { %908 = vmatpush3.bf16.msra.mxu1 %v907_v23 }
 0x44f   :  { %899 = vmatpush3.bf16.msra.mxu0 %v898_v15  ;;  %909 = vmatprep.subr.bf16.mxu1 %v1041_v0 }
 0x450   :  { %900 = vmatprep.subr.bf16.mxu0 %v1041_v0 }
 0x452   :  { %911 = vmatpush3.bf16.msra.mxu1 %v910_v26 }
 0x453   :  { %902 = vmatpush3.bf16.msra.mxu0 %v901_v18  ;;  %912 = vmatprep.subr.bf16.mxu1 %v1041_v0 }
 0x456   :  { %914 = vmatpush3.bf16.msra.mxu1 %v913_v29 }
 0x457   :  { %915 = vmatprep.subr.bf16.mxu1 %v1041_v0 }
 0x45a   :  { %917 = vmatpush3.bf16.msra.mxu1 %v916_v32 }
 0x45b   :  { %918 = vmatprep.subr.bf16.mxu1 %v1041_v0 }
 0x45e   :  { %920 = vmatpush3.bf16.msra.mxu1 %v919_v35 }
 0x45f   :  { %921 = vmatprep.subr.bf16.mxu1 %v1041_v0 }
 0x462   :  { %923 = vmatpush3.bf16.msra.mxu1 %v922_v38 }
 0x463   :  { %924 = vmatprep.subr.bf16.mxu1 %v1041_v0  ;;  %v663_v0 = vld [vmem:[%s1380_s11] ss:$0 sm:$0xff] }
 0x466   :  { %926 = vmatpush3.bf16.msra.mxu1 %v925_v46 }
 0x519   :  { %v460_v40 = vpop.f32.mrb[4].mxu0 }
 0x51a   :  { %v461_v41 = vadd.f32 %v661_v39, %v460_v40  ;;  %v794_v42 = vpop.f32.mrb[5].mxu0 }
 0x51c   :  { %v464_v43 = vmax.f32 %v461_v41, 0.0 }
 0x51e   :  { %812 = vmatmul.mubr.msk.f32.vlgmr.msra.gmra.mrb[6].mxu0 %vm292_vm2, %v464_v43 }
 0x5f1   :  { %v549_v47 = vpop.f32.mrb[6].mxu0 }
 0x5f2   :  { %v550_v48 = vadd.f32 %v663_v0, %v549_v47  ;;  %v813_v49 = vpop.f32.mrb[7].mxu0 }
 0x5f4   :  { %v553_v50 = vmax.f32 %v550_v48, 0.0 }
 0x5f6   :  { %847 = vmatmul.mubr.f32.vlgmr.msra.gmra.mrb[2].mxu1 %v553_v50 }
 0x6c9   :  { %v643_v52 = vpop.f32.mrb[2].mxu1 }
 0x6ca   :  { %v644_v53 = vadd.f32 %v665_v51, %v643_v52  ;;  %v848_v54 = vpop.f32.mrb[3].mxu1 }
 0x6cc   :  { %v647_v55 = vadd.f32 %v644_v53, %v1293_v57 }
 0x6ce   :  { %648 = vst [vmem:[%s1383_s14] sm:$0xff] %v647_v55 }
 0x6cf   :  { %653 = vsyncpa [#allocation3], 1 }
 0x6d0   :  { %654 = vsyncpa [#allocation5], 1 }
 0x6d1   :  { %655 = vsyncpa [#allocation8], 1 }

</bundles_post_ra>
